<compile_context>
chip_gen: v7x
topology: tpu7x:2x2x1
jax: 0.10.0
libtpu: 0.0.40
codegen_flags: <defaults>
</compile_context>

<pallas_src>
import functools

import jax
import jax.numpy as jnp
from jax.experimental import pallas as pl
from jax.experimental.pallas import tpu as pltpu


def _round_up(x, m):
    return (x + m - 1) // m * m


def _mlp_kernel(x_ref, w1_ref, b1_ref, w2_ref, b2_ref, w3t_ref, b3_ref, o_ref):
    # Layer 1: (TB, F) @ (F, 128) + b1 -> ReLU      (MXU, f32 accumulate)
    h1 = jnp.dot(x_ref[...], w1_ref[...], preferred_element_type=jnp.float32)
    h1 = jnp.maximum(h1 + b1_ref[...], 0.0)
    # Dropout(p=0.5): identity in eval mode.

    # Layer 2: (TB, 128) @ (128, 64) + b2 -> ReLU   (MXU, f32 accumulate)
    h2 = jnp.dot(h1, w2_ref[...], preferred_element_type=jnp.float32)
    h2 = jnp.maximum(h2 + b2_ref[...], 0.0)
    # Dropout(p=0.5): identity in eval mode.

    # Layer 3: output width is 1 -> VPU multiply + lane reduction instead of
    # an MXU matmul with a 1-wide RHS.  w3t is (1, 64), b3 is a scalar in SMEM.
    h3 = jnp.sum(h2 * w3t_ref[...], axis=-1, keepdims=True) + b3_ref[0, 0]
    o_ref[...] = jnp.maximum(h3, 0.0).astype(o_ref.dtype)


@functools.partial(jax.jit, static_argnames=("block_b",))
def lambda_mlp(x, w1, b1, w2, b2, w3, b3, *, block_b=512):
    """Full MLP forward pass in one batch-tiled Pallas kernel.

    x : (B, in_features) float32
    w1: (in_features, 128), b1: (1, 128)
    w2: (128, 64),          b2: (1, 64)
    w3: (64, 1),            b3: (1, 1)
    returns (B, 1) float32
    """
    B, F = x.shape

    # Batch tile: multiple of 8 sublanes, capped at block_b (256-aligned by
    # default for full MXU passes).  Pad the batch to a tile multiple.
    tb = min(block_b, _round_up(max(B, 1), 8))
    b_pad = _round_up(B, tb)
    if b_pad != B:
        x = jnp.pad(x, ((0, b_pad - B), (0, 0)))

    # Reshape the 1-wide last layer for lane-wise broadcast / scalar add.
    w3t = jnp.reshape(w3, (1, 64)).astype(jnp.float32)
    b3s = jnp.reshape(b3, (1, 1)).astype(jnp.float32)

    grid = (b_pad // tb,)

    # Weights/biases: constant block index across the batch grid -> Pallas
    # keeps them VMEM-resident instead of re-DMAing every step.
    def resident(a):
        return pl.BlockSpec(a.shape, lambda i: (0, 0))

    out = pl.pallas_call(
        _mlp_kernel,
        out_shape=jax.ShapeDtypeStruct((b_pad, 1), jnp.float32),
        grid=grid,
        in_specs=[
            pl.BlockSpec((tb, F), lambda i: (i, 0)),          # x: streamed tiles
            resident(w1),
            resident(b1),
            resident(w2),
            resident(b2),
            resident(w3t),
            pl.BlockSpec(memory_space=pltpu.MemorySpace.SMEM),  # b3 scalar
        ],
        out_specs=pl.BlockSpec((tb, 1), lambda i: (i, 0)),
        compiler_params=pltpu.CompilerParams(
            dimension_semantics=("parallel",),
        ),
    )(x, w1, b1, w2, b2, w3t, b3s)

    return out[:B]


def init_params(key, in_features):
    """Deterministic, PyTorch-Linear-style (uniform +/- 1/sqrt(fan_in)) init."""
    ks = jax.random.split(key, 6)

    def linear(kw, kb, fan_in, fan_out):
        bound = 1.0 / jnp.sqrt(fan_in)
        w = jax.random.uniform(kw, (fan_in, fan_out), jnp.float32, -bound, bound)
        b = jax.random.uniform(kb, (1, fan_out), jnp.float32, -bound, bound)
        return w, b

    w1, b1 = linear(ks[0], ks[1], in_features, 128)
    w2, b2 = linear(ks[2], ks[3], 128, 64)
    w3, b3 = linear(ks[4], ks[5], 64, 1)
    return w1, b1, w2, b2, w3, b3


def reference_mlp(x, w1, b1, w2, b2, w3, b3):
    h = jnp.maximum(x @ w1 + b1, 0.0)
    h = jnp.maximum(h @ w2 + b2, 0.0)
    return jnp.maximum(h @ w3 + b3, 0.0)


if __name__ == "__main__":
    key = jax.random.PRNGKey(0)
    in_features = 32

    kx, kp, kx2 = jax.random.split(key, 3)
    params = init_params(kp, in_features)

    # Small batch (single grid step, tb clipped to 8).
    batch = 8
    x = jax.random.normal(kx, (batch, in_features), jnp.float32)
    out = jax.block_until_ready(lambda_mlp(x, *params))
    ref = reference_mlp(x, *params)
    assert out.shape == (batch, 1)
    assert jnp.allclose(out, ref, atol=1e-5, rtol=1e-5), "mismatch vs reference (B=8)"

    # Non-multiple batch with multiple grid steps (exercises padding + tiling).
    batch2 = 300
    x2 = jax.random.normal(kx2, (batch2, in_features), jnp.float32)
    out2 = jax.block_until_ready(lambda_mlp(x2, *params, block_b=128))
    ref2 = reference_mlp(x2, *params)
    assert out2.shape == (batch2, 1)
    assert jnp.allclose(out2, ref2, atol=1e-5, rtol=1e-5), "mismatch vs reference (B=300)"

    print("KERNEL_OK")
</pallas_src>

<mosaic_0001>
module attributes {stable_mosaic.version = 11 : i64} {
  func.func @_mlp_kernel(%arg0: i32, %arg1: memref<8x32xf32, #tpu.memory_space<vmem>>, %arg2: memref<32x128xf32, #tpu.memory_space<vmem>>, %arg3: memref<1x128xf32, #tpu.memory_space<vmem>>, %arg4: memref<128x64xf32, #tpu.memory_space<vmem>>, %arg5: memref<1x64xf32, #tpu.memory_space<vmem>>, %arg6: memref<1x64xf32, #tpu.memory_space<vmem>>, %arg7: memref<1x1xf32, #tpu.memory_space<smem>>, %arg8: memref<8x1xf32, #tpu.memory_space<vmem>>) attributes {dimension_semantics = [#tpu.dimension_semantics<parallel>], iteration_bounds = array<i64: 1>, scalar_prefetch = 0 : i64, scratch_operands = 0 : i64, tpu.core_type = #tpu.core_type<tc>, window_params = [{transform_indices = @transform_0, window_bounds = array<i64: 8, 32>}, {pipeline_mode = #tpu.pipeline_mode<synchronous>, transform_indices = @transform_1, window_bounds = array<i64: 32, 128>}, {pipeline_mode = #tpu.pipeline_mode<synchronous>, transform_indices = @transform_2, window_bounds = array<i64: 1, 128>}, {pipeline_mode = #tpu.pipeline_mode<synchronous>, transform_indices = @transform_3, window_bounds = array<i64: 128, 64>}, {pipeline_mode = #tpu.pipeline_mode<synchronous>, transform_indices = @transform_4, window_bounds = array<i64: 1, 64>}, {pipeline_mode = #tpu.pipeline_mode<synchronous>, transform_indices = @transform_5, window_bounds = array<i64: 1, 64>}, {transform_indices = @transform_6, window_bounds = array<i64: 1, 1>}, {transform_indices = @transform_7, window_bounds = array<i64: 8, 1>}]} {
    %c0 = arith.constant 0 : index
    %c0_0 = arith.constant 0 : index
    %0 = vector.load %arg1[%c0, %c0_0] : memref<8x32xf32, #tpu.memory_space<vmem>>, vector<8x32xf32>
    %c0_1 = arith.constant 0 : index
    %c0_2 = arith.constant 0 : index
    %1 = vector.load %arg2[%c0_1, %c0_2] : memref<32x128xf32, #tpu.memory_space<vmem>>, vector<32x128xf32>
    %cst = arith.constant dense<0.000000e+00> : vector<8x128xf32>
    %2 = tpu.matmul %0, %1, %cst {dimension_numbers = #tpu.dot_dimension_numbers<[1], [0], [0], [1], [0, 0, 1, 1], [], []>} : vector<8x32xf32>, vector<32x128xf32>, vector<8x128xf32> -> vector<8x128xf32>
    %c0_3 = arith.constant 0 : index
    %c0_4 = arith.constant 0 : index
    %3 = vector.load %arg3[%c0_3, %c0_4] : memref<1x128xf32, #tpu.memory_space<vmem>>, vector<1x128xf32>
    %4 = vector.broadcast %3 : vector<1x128xf32> to vector<8x128xf32>
    %5 = arith.addf %2, %4 : vector<8x128xf32>
    %cst_5 = arith.constant 0.000000e+00 : f32
    %6 = vector.broadcast %cst_5 : f32 to vector<8x128xf32>
    %7 = arith.maximumf %5, %6 : vector<8x128xf32>
    %c0_6 = arith.constant 0 : index
    %c0_7 = arith.constant 0 : index
    %8 = vector.load %arg4[%c0_6, %c0_7] : memref<128x64xf32, #tpu.memory_space<vmem>>, vector<128x64xf32>
    %cst_8 = arith.constant dense<0.000000e+00> : vector<8x64xf32>
    %9 = tpu.matmul %7, %8, %cst_8 {dimension_numbers = #tpu.dot_dimension_numbers<[1], [0], [0], [1], [0, 0, 1, 1], [], []>} : vector<8x128xf32>, vector<128x64xf32>, vector<8x64xf32> -> vector<8x64xf32>
    %c0_9 = arith.constant 0 : index
    %c0_10 = arith.constant 0 : index
    %10 = vector.load %arg5[%c0_9, %c0_10] : memref<1x64xf32, #tpu.memory_space<vmem>>, vector<1x64xf32>
    %11 = vector.broadcast %10 : vector<1x64xf32> to vector<8x64xf32>
    %12 = arith.addf %9, %11 : vector<8x64xf32>
    %cst_11 = arith.constant 0.000000e+00 : f32
    %13 = vector.broadcast %cst_11 : f32 to vector<8x64xf32>
    %14 = arith.maximumf %12, %13 : vector<8x64xf32>
    %c0_12 = arith.constant 0 : index
    %c0_13 = arith.constant 0 : index
    %15 = vector.load %arg6[%c0_12, %c0_13] : memref<1x64xf32, #tpu.memory_space<vmem>>, vector<1x64xf32>
    %16 = vector.broadcast %15 : vector<1x64xf32> to vector<8x64xf32>
    %17 = arith.mulf %14, %16 : vector<8x64xf32>
    %cst_14 = arith.constant dense<0.000000e+00> : vector<8xf32>
    %18 = vector.multi_reduction <add>, %17, %cst_14 [1] : vector<8x64xf32> to vector<8xf32>
    %19 = vector.shape_cast %18 : vector<8xf32> to vector<8x1xf32>
    %c0_15 = arith.constant 0 : index
    %c0_16 = arith.constant 0 : index
    %20 = memref.load %arg7[%c0_15, %c0_16] : memref<1x1xf32, #tpu.memory_space<smem>>
    %21 = vector.broadcast %20 : f32 to vector<8x1xf32>
    %22 = arith.addf %19, %21 : vector<8x1xf32>
    %cst_17 = arith.constant 0.000000e+00 : f32
    %23 = vector.broadcast %cst_17 : f32 to vector<8x1xf32>
    %24 = arith.maximumf %22, %23 : vector<8x1xf32>
    %c0_18 = arith.constant 0 : index
    %c0_19 = arith.constant 0 : index
    %25 = vector.load %arg8[%c0_18, %c0_19] : memref<8x1xf32, #tpu.memory_space<vmem>>, vector<8x1xf32>
    tpu.vector_store %arg8[%c0_18, %c0_19], %24 {strides = array<i32>} : memref<8x1xf32, #tpu.memory_space<vmem>>, vector<8x1xf32>,
    return
  }
  func.func @transform_0(%arg0: i32) -> (i32, i32) {
    %c0_i32 = arith.constant 0 : i32
    %c0_i32_0 = arith.constant 0 : i32
    return %arg0, %c0_i32 : i32, i32
  }
  func.func @transform_1(%arg0: i32) -> (i32, i32) {
    %c0_i32 = arith.constant 0 : i32
    %c0_i32_0 = arith.constant 0 : i32
    %c0_i32_1 = arith.constant 0 : i32
    return %c0_i32, %c0_i32_0 : i32, i32
  }
  func.func @transform_2(%arg0: i32) -> (i32, i32) {
    %c0_i32 = arith.constant 0 : i32
    %c0_i32_0 = arith.constant 0 : i32
    %c0_i32_1 = arith.constant 0 : i32
    return %c0_i32, %c0_i32_0 : i32, i32
  }
  func.func @transform_3(%arg0: i32) -> (i32, i32) {
    %c0_i32 = arith.constant 0 : i32
    %c0_i32_0 = arith.constant 0 : i32
    %c0_i32_1 = arith.constant 0 : i32
    return %c0_i32, %c0_i32_0 : i32, i32
  }
  func.func @transform_4(%arg0: i32) -> (i32, i32) {
    %c0_i32 = arith.constant 0 : i32
    %c0_i32_0 = arith.constant 0 : i32
    %c0_i32_1 = arith.constant 0 : i32
    return %c0_i32, %c0_i32_0 : i32, i32
  }
  func.func @transform_5(%arg0: i32) -> (i32, i32) {
    %c0_i32 = arith.constant 0 : i32
    %c0_i32_0 = arith.constant 0 : i32
    %c0_i32_1 = arith.constant 0 : i32
    return %c0_i32, %c0_i32_0 : i32, i32
  }
  func.func @transform_6(%arg0: i32) -> (i32, i32) {
    %c0_i32 = arith.constant 0 : i32
    %c0_i32_0 = arith.constant 0 : i32
    %c0_i32_1 = arith.constant 0 : i32
    return %c0_i32, %c0_i32_0 : i32, i32
  }
  func.func @transform_7(%arg0: i32) -> (i32, i32) {
    %c0_i32 = arith.constant 0 : i32
    %c0_i32_0 = arith.constant 0 : i32
    return %arg0, %c0_i32 : i32, i32
  }
}

</mosaic_0001>

<bundles_post_ra>
// kernel: lambda_mlp.1
= control target key start
LH: loop header
LB: loop body
LE: loop exit
PB: predicated region body
PF: predicated region fallthrough
CT: control target
= control target key end

     0   :  { %v335_v0 = vmov 0.0|0.0   ;;  %vm336_vm0 = vmmov 0   ;;  %v337_v4 = vmov 0.0   ;;  %vm39_vm1 = vcmask 261120   ;;  %s456_s1 = inlined_call_operand.vmem [shape: f32[32,128], index: 1, kind: input, shape index: {}]   ;;  %s457_s3 = inlined_call_operand.vmem [shape: f32[128,64], index: 3, kind: input, shape index: {}]   ;;  %s458_s0 = inlined_call_operand.vmem [shape: f32[8,32], index: 0, kind: input, shape index: {}]   ;;  %s459_s2 = inlined_call_operand.vmem [shape: f32[1,128], index: 2, kind: input, shape index: {}]   ;;  %s460_s4 = inlined_call_operand.vmem [shape: f32[1,64], index: 4, kind: input, shape index: {}]   ;;  %s461_s5 = inlined_call_operand.vmem [shape: f32[1,64], index: 5, kind: input, shape index: {}]   ;;  %s462_s6 = inlined_call_operand.<no memory space> [shape: f32[1,1], index: 6, kind: input, shape index: {}]   ;;  %s463_s7 = inlined_call_operand.vmem [shape: f32[8,1], index: 7, kind: output, shape index: {}]  }
   0x1   :  { %302 = vmatprep.subr.bf16.mxu0 %v335_v0  ;;  %v28_v1 = vld [vmem:[%s456_s1] sm:$0xff]  ;;  %v29_v2 = vld [vmem:[%s456_s1 + $0x8] sm:$0xff]  ;;  %v30_v3 = vld [vmem:[%s456_s1 + $0x10] sm:$0xff]  ;;  %264 = vmatprep.mubr.msk.f32.mxu0 %vm336_vm0, %v337_v4  ;;  %vm216_vm2 = vcmask 523264   ;;  %v221_v46 = vstv %s462_s6  ;;  %vm224_vm3 = vcmask 7168  }
   0x2   :  { %v303_v5 = vpack.c.bf16 %v29_v2, %v28_v1  ;;  %v31_v6 = vld [vmem:[%s456_s1 + $0x18] sm:$0xff]  ;;  %308 = vmatprep.subr.bf16.mxu1 %v335_v0  ;;  %v114_v7 = vld [vmem:[%s457_s3] sm:$0xff]  ;;  %299 = vmatprep.mubr.msk.f32.mxu1 %vm336_vm0, %v337_v4  ;;  %v115_v8 = vld [vmem:[%s457_s3 + $0x8] sm:$0xff] }
   0x3   :  { %v116_v9 = vld [vmem:[%s457_s3 + $0x10] sm:$0xff]  ;;  %v117_v10 = vld [vmem:[%s457_s3 + $0x18] sm:$0xff]  ;;  %v306_v11 = vpack.c.bf16 %v31_v6, %v30_v3  ;;  %v309_v12 = vpack.c.bf16 %v115_v8, %v114_v7  ;;  %v118_v14 = vld [vmem:[%s457_s3 + $0x20] sm:$0xff] }
   0x4   :  { %304 = vmatpush3.bf16.msra.mxu0 %v303_v5  ;;  %v312_v13 = vpack.c.bf16 %v117_v10, %v116_v9  ;;  %v119_v15 = vld [vmem:[%s457_s3 + $0x28] sm:$0xff]  ;;  %v27_v16 = vld [vmem:[%s458_s0] sm:$0xff]  ;;  %v120_v18 = vld [vmem:[%s457_s3 + $0x30] sm:$0xff] }
   0x5   :  { %305 = vmatprep.subr.bf16.mxu0 %v335_v0  ;;  %310 = vmatpush3.bf16.msra.mxu1 %v309_v12  ;;  %v315_v17 = vpack.c.bf16 %v119_v15, %v118_v14  ;;  %v121_v19 = vld [vmem:[%s457_s3 + $0x38] sm:$0xff]  ;;  %v122_v21 = vld [vmem:[%s457_s3 + $0x40] sm:$0xff]  ;;  %v123_v22 = vld [vmem:[%s457_s3 + $0x48] sm:$0xff] }
   0x6   :  { %311 = vmatprep.subr.bf16.mxu1 %v335_v0  ;;  %v318_v20 = vpack.c.bf16 %v121_v19, %v120_v18  ;;  %v321_v23 = vpack.c.bf16 %v123_v22, %v122_v21  ;;  %v124_v24 = vld [vmem:[%s457_s3 + $0x50] sm:$0xff]  ;;  %v125_v25 = vld [vmem:[%s457_s3 + $0x58] sm:$0xff]  ;;  %v126_v27 = vld [vmem:[%s457_s3 + $0x60] sm:$0xff] }
   0x7   :  { %v324_v26 = vpack.c.bf16 %v125_v25, %v124_v24  ;;  %v127_v28 = vld [vmem:[%s457_s3 + $0x68] sm:$0xff]  ;;  %v128_v30 = vld [vmem:[%s457_s3 + $0x70] sm:$0xff]  ;;  %v129_v31 = vld [vmem:[%s457_s3 + $0x78] sm:$0xff] }
   0x8   :  { %307 = vmatpush3.bf16.msra.mxu0 %v306_v11  ;;  %v327_v29 = vpack.c.bf16 %v127_v28, %v126_v27  ;;  %v330_v32 = vpack.c.bf16 %v129_v31, %v128_v30  ;;  %v230_v33 = vld [vmem:[%s459_s2] ss:$0 sm:$0xff] }
   0x9   :  { %313 = vmatpush3.bf16.msra.mxu1 %v312_v13  ;;  %v232_v38 = vld [vmem:[%s460_s4] ss:$0 sm:$0xff] }
   0xa   :  { %314 = vmatprep.subr.bf16.mxu1 %v335_v0  ;;  %v233_v42 = vld [vmem:[%s461_s5] ss:$0 sm:$0xff] }
   0xb   :  { %265 = vmatmul.mubr.msk.f32.vlgmr.msra.gmra.mrb[0].mxu0 %vm39_vm1, %v27_v16 }
   0xd   :  { %316 = vmatpush3.bf16.msra.mxu1 %v315_v17 }
   0xe   :  { %317 = vmatprep.subr.bf16.mxu1 %v335_v0 }
  0x11   :  { %319 = vmatpush3.bf16.msra.mxu1 %v318_v20 }
  0x12   :  { %320 = vmatprep.subr.bf16.mxu1 %v335_v0 }
  0x15   :  { %322 = vmatpush3.bf16.msra.mxu1 %v321_v23 }
  0x16   :  { %323 = vmatprep.subr.bf16.mxu1 %v335_v0 }
  0x19   :  { %325 = vmatpush3.bf16.msra.mxu1 %v324_v26 }
  0x1a   :  { %326 = vmatprep.subr.bf16.mxu1 %v335_v0 }
  0x1d   :  { %328 = vmatpush3.bf16.msra.mxu1 %v327_v29 }
  0x1e   :  { %329 = vmatprep.subr.bf16.mxu1 %v335_v0 }
  0x21   :  { %331 = vmatpush3.bf16.msra.mxu1 %v330_v32 }
  0xde   :  { %v109_v34 = vpop.f32.mrb[0].mxu0 }
  0xdf   :  { %v110_v35 = vadd.f32 %v230_v33, %v109_v34  ;;  %v266_v36 = vpop.f32.mrb[1].mxu0 }
  0xe1   :  { %v113_v37 = vmax.f32 %v110_v35, 0.0 }
  0xe3   :  { %300 = vmatmul.mubr.f32.vlgmr.msra.gmra.mrb[0].mxu1 %v113_v37 }
 0x1b6   :  { %v203_v39 = vpop.f32.mrb[0].mxu1 }
 0x1b7   :  { %v204_v40 = vadd.f32 %v232_v38, %v203_v39  ;;  %v301_v41 = vpop.f32.mrb[1].mxu1 }
 0x1b9   :  { %v207_v43 = vmax.f32 %v204_v40, 0.0 }
 0x1bb   :  { %v215_v44 = vmul.f32 %v233_v42, %v207_v43 }
 0x1bd   :  { %v217_v45 = vsel %vm216_vm2, %v215_v44, 0.0 }
 0x1be   :  { %218 = vadd.xlane.f32.xlu0 %v217_v45 }
 0x24b   :  { %v219_v47 = vpop.xlane.xlu0 %218 }
 0x24c   :  { %v222_v48 = vadd.f32 %v221_v46, %v219_v47 }
 0x24e   :  { %v223_v49 = vmax.f32 %v222_v48, 0.0 }
 0x250   :  { %225 = vst.msk [vmem:[%s463_s7] sm:$0xff] %vm224_vm3, %v223_v49 }

</bundles_post_ra>
